<compile_context>
chip_gen: v7x
topology: tpu7x:2x2x1
jax: 0.10.0
libtpu: 0.0.40
codegen_flags: <defaults>
</compile_context>

<pallas_src>
import jax
import jax.numpy as jnp
from jax.experimental import pallas as pl
from jax.experimental.pallas import tpu as pltpu


LANE = 128            # TPU lane width; fc feature dims are zero-padded to a multiple of this.
MAX_BATCH_TILE = 2048  # cap on rows per batch tile (keeps f32 intermediates small everywhere)


def _round_up(x, m):
    return (x + m - 1) // m * m


def _choose_tiling(B, block_batch=None):
    """Pick (tile_rows, padded_batch).

    * B < 256: a single tile covering the whole (sublane-padded) batch -> grid=(1,).
    * B >= 256: an even number of multiple-of-128 tiles (capped at MAX_BATCH_TILE rows)
      so the ("parallel",) grid keeps both v7x TensorCores busy while amortizing the
      ~0.35us/step pipeline overhead.
    """
    b8 = _round_up(max(B, 1), 8)
    if block_batch is not None:
        if block_batch >= b8:
            return b8, b8
        tb = max(LANE, _round_up(block_batch, LANE))
        return tb, _round_up(b8, tb)
    if b8 < 2 * LANE:
        return b8, b8
    tb = min(MAX_BATCH_TILE, _round_up(b8, 2 * LANE) // 2)
    return tb, _round_up(b8, 2 * tb)


def critic_kernel(s_ref, a_ref, w1s_ref, w1a_ref, b1_ref, w2_ref, b2_ref,
                  wq_ref, bq_ref, q_ref):
    """One batch tile: q[1, TB] for TB rows of (state, action)."""
    compute_dtype = w1s_ref.dtype  # bf16 (or f32); activations arrive already in this dtype

    # fc1 as a split matmul: state @ W1s + action @ W1a  (replaces torch.cat)
    h1 = jnp.dot(s_ref[...], w1s_ref[...], preferred_element_type=jnp.float32)
    h1 = h1 + jnp.dot(a_ref[...], w1a_ref[...], preferred_element_type=jnp.float32)
    h1 = jnp.maximum(h1 + b1_ref[...], 0.0)              # f32 bias + ReLU (VPU)

    # fc2
    h2 = jnp.dot(h1.astype(compute_dtype), w2_ref[...],
                 preferred_element_type=jnp.float32)
    h2 = jnp.maximum(h2 + b2_ref[...], 0.0)              # f32 bias + ReLU (VPU)

    # q head (fc2 -> 1): VPU multiply + lane reduction (MXU stays free, no N=1 matmul).
    # Result lands with batch on the lane axis -> unmasked lane-dense store.
    q = jnp.sum(h2 * wq_ref[...], axis=-1)               # (TB,)
    q_ref[...] = (q[None, :] + bq_ref[0, 0]).astype(q_ref.dtype)  # (1, TB), bq from SMEM


def init_linear(key, fan_in, fan_out):
    """PyTorch-style Linear init: U(-1/sqrt(fan_in), 1/sqrt(fan_in)).
    Weight stored as [fan_in, fan_out] (transposed vs torch) for x @ W."""
    kw, kb = jax.random.split(key)
    bound = 1.0 / jnp.sqrt(jnp.float32(fan_in))
    w = jax.random.uniform(kw, (fan_in, fan_out), jnp.float32, -bound, bound)
    b = jax.random.uniform(kb, (fan_out,), jnp.float32, -bound, bound)
    return w, b


def pack_critic_params(w1, b1, w2, b2, wq, bq, input_dims,
                       compute_dtype=jnp.bfloat16):
    """Split W1, zero-pad fc dims to 128 lanes, and cast matmul operands once.

    Zero padding is numerically inert: padded b1/b2 columns are 0, ReLU(0)=0,
    and padded W2/Wq rows/cols are 0, so padded features never contribute.
    """
    f1 = w1.shape[1]
    f2 = w2.shape[1]
    f1p = _round_up(f1, LANE)
    f2p = _round_up(f2, LANE)

    def pad_cols(x, n_cols):
        return jnp.pad(x, ((0, 0), (0, n_cols - x.shape[1])))

    w1s = pad_cols(w1[:input_dims], f1p).astype(compute_dtype)
    w1a = pad_cols(w1[input_dims:], f1p).astype(compute_dtype)
    b1p = pad_cols(jnp.reshape(b1, (1, -1)), f1p).astype(jnp.float32)
    w2p = jnp.pad(w2, ((0, f1p - f1), (0, f2p - f2))).astype(compute_dtype)
    b2p = pad_cols(jnp.reshape(b2, (1, -1)), f2p).astype(jnp.float32)
    wqp = pad_cols(jnp.reshape(wq, (1, -1)), f2p).astype(jnp.float32)
    bqp = jnp.reshape(bq, (1, 1)).astype(jnp.float32)     # SMEM scalar
    return (w1s, w1a, b1p, w2p, b2p, wqp, bqp)


def critic_forward(state, action, packed_params, *, block_batch=None):
    """state: (B, input_dims), action: (B, n_agents*n_actions) -> q: (B, 1)."""
    w1s, w1a, b1, w2, b2, wq, bq = packed_params
    B, S = state.shape
    A = action.shape[1]
    f1p = w1s.shape[1]
    f2p = w2.shape[1]
    compute_dtype = w1s.dtype
    itemsize = jnp.dtype(compute_dtype).itemsize

    tb, b_pad = _choose_tiling(B, block_batch)
    grid = (b_pad // tb,)

    # Stream activations as the matmul compute dtype (bf16): halves HBM reads and
    # removes the in-kernel cast. Only pad when the batch isn't already tile-aligned
    # (pad+cast fuse into one op under jit; no f32 padded copies on the hot path).
    if b_pad != B:
        state_p = jnp.pad(state.astype(compute_dtype), ((0, b_pad - B), (0, 0)))
        action_p = jnp.pad(action.astype(compute_dtype), ((0, b_pad - B), (0, 0)))
    else:
        state_p = state.astype(compute_dtype)
        action_p = action.astype(compute_dtype)

    def resident(shape):
        # Full-array block with a constant index_map -> stays VMEM-resident across the grid.
        return pl.BlockSpec(shape, lambda i: (0, 0))

    # VMEM budget (double-buffered activation/output tiles + resident weights + f32
    # intermediates); raise the scoped-VMEM limit only as needed (v5e default is 16 MiB).
    vmem_est = (
        2 * tb * (S + A) * itemsize                      # state/action tiles (2 bufs)
        + 2 * tb * 4                                     # q output tile (2 bufs)
        + 2 * ((S + A) * f1p + f1p * f2p) * itemsize     # weights (worst case 2 bufs)
        + 2 * (f1p + 2 * f2p) * 4                        # b1, b2, wq
        + tb * (f1p + f2p) * 4                           # h1/h2 f32 intermediates
    )
    vmem_limit = int(min(64 * 2**20, max(32 * 2**20, 2 * vmem_est)))

    cost = pl.CostEstimate(
        flops=int(2 * b_pad * ((S + A) * f1p + f1p * f2p + f2p)),
        transcendentals=0,
        bytes_accessed=int(
            b_pad * (S + A) * itemsize + b_pad * 4
            + ((S + A) * f1p + f1p * f2p) * itemsize + (f1p + 2 * f2p + 1) * 4),
    )

    q_row = pl.pallas_call(
        critic_kernel,
        out_shape=jax.ShapeDtypeStruct((1, b_pad), jnp.float32),
        grid=grid,
        in_specs=[
            pl.BlockSpec((tb, S), lambda i: (i, 0)),   # state tile (bf16)
            pl.BlockSpec((tb, A), lambda i: (i, 0)),   # action tile (bf16)
            resident((S, f1p)),                        # W1_state
            resident((A, f1p)),                        # W1_action
            resident((1, f1p)),                        # b1
            resident((f1p, f2p)),                      # W2
            resident((1, f2p)),                        # b2
            resident((1, f2p)),                        # wq (row vector)
            pl.BlockSpec(memory_space=pltpu.MemorySpace.SMEM),   # bq scalar in SMEM
        ],
        out_specs=pl.BlockSpec((1, tb), lambda i: (0, i)),   # lane-dense q
        compiler_params=pltpu.CompilerParams(
            dimension_semantics=("parallel",),         # batch tiles split across TCs (v7x)
            vmem_limit_bytes=vmem_limit),
        cost_estimate=cost,
    )(state_p, action_p, w1s, w1a, b1, w2, b2, wq, bq)

    return q_row.reshape(-1, 1)[:B]


def _ref_forward_f32(state, action, w1, b1, w2, b2, wq, bq):
    x = jnp.concatenate([state, action], axis=1)
    h1 = jnp.maximum(x @ w1 + b1, 0.0)
    h2 = jnp.maximum(h1 @ w2 + b2, 0.0)
    return h2 @ wq + bq


if __name__ == "__main__":
    # Small shapes consistent with the module's forward.
    batch = 8
    input_dims = 16
    n_agents = 2
    n_actions = 4
    fc1_dims = 64
    fc2_dims = 64
    cat_dims = input_dims + n_agents * n_actions  # 24

    key = jax.random.PRNGKey(0)
    k_state, k_action, k1, k2, k3 = jax.random.split(key, 5)

    state = jax.random.normal(k_state, (batch, input_dims), jnp.float32)
    action = jax.random.normal(k_action, (batch, n_agents * n_actions), jnp.float32)

    w1, b1 = init_linear(k1, cat_dims, fc1_dims)
    w2, b2 = init_linear(k2, fc1_dims, fc2_dims)
    wq, bq = init_linear(k3, fc2_dims, 1)

    packed = pack_critic_params(w1, b1, w2, b2, wq, bq, input_dims,
                                compute_dtype=jnp.bfloat16)

    fwd = jax.jit(critic_forward)  # jit fuses the wrapper-side pad/cast with surrounding ops

    # --- run 1: tiny batch (single-tile path) ---
    q = jax.block_until_ready(fwd(state, action, packed))
    assert q.shape == (batch, 1)

    # Reference 1: exact PyTorch-semantics forward in pure f32 (loose tol: kernel uses bf16 matmuls).
    q_f32 = _ref_forward_f32(state, action, w1, b1, w2, b2, wq, bq)
    assert jnp.allclose(q, q_f32, atol=5e-2, rtol=5e-2)

    # Reference 2: same math/precision as the kernel (bf16 operands, f32 accumulation) — tight tol.
    bf16 = jnp.bfloat16
    h1b = jnp.maximum(
        jnp.dot(state.astype(bf16), w1[:input_dims].astype(bf16),
                preferred_element_type=jnp.float32)
        + jnp.dot(action.astype(bf16), w1[input_dims:].astype(bf16),
                  preferred_element_type=jnp.float32)
        + b1, 0.0)
    h2b = jnp.maximum(
        jnp.dot(h1b.astype(bf16), w2.astype(bf16),
                preferred_element_type=jnp.float32) + b2, 0.0)
    q_bf = jnp.sum(h2b * wq.reshape(1, -1), axis=-1, keepdims=True) + bq
    assert jnp.allclose(q, q_bf, atol=2e-3, rtol=2e-3)

    # --- run 2: replay-buffer-sized batch (multi-tile, 2-core path with batch padding) ---
    batch2 = 384
    ks2, ka2 = jax.random.split(jax.random.PRNGKey(1))
    state2 = jax.random.normal(ks2, (batch2, input_dims), jnp.float32)
    action2 = jax.random.normal(ka2, (batch2, n_agents * n_actions), jnp.float32)
    q2 = jax.block_until_ready(fwd(state2, action2, packed))
    assert q2.shape == (batch2, 1)
    q2_f32 = _ref_forward_f32(state2, action2, w1, b1, w2, b2, wq, bq)
    assert jnp.allclose(q2, q2_f32, atol=5e-2, rtol=5e-2)

    print("KERNEL_OK")
</pallas_src>

<mosaic_0001>
module attributes {stable_mosaic.version = 11 : i64} {
  func.func @critic_kernel(%arg0: i32, %arg1: memref<8x16xbf16, #tpu.memory_space<vmem>>, %arg2: memref<8x8xbf16, #tpu.memory_space<vmem>>, %arg3: memref<16x128xbf16, #tpu.memory_space<vmem>>, %arg4: memref<8x128xbf16, #tpu.memory_space<vmem>>, %arg5: memref<1x128xf32, #tpu.memory_space<vmem>>, %arg6: memref<128x128xbf16, #tpu.memory_space<vmem>>, %arg7: memref<1x128xf32, #tpu.memory_space<vmem>>, %arg8: memref<1x128xf32, #tpu.memory_space<vmem>>, %arg9: memref<1x1xf32, #tpu.memory_space<smem>>, %arg10: memref<1x8xf32, #tpu.memory_space<vmem>>) attributes {dimension_semantics = [#tpu.dimension_semantics<parallel>], iteration_bounds = array<i64: 1>, scalar_prefetch = 0 : i64, scratch_operands = 0 : i64, tpu.core_type = #tpu.core_type<tc>, window_params = [{transform_indices = @transform_0, window_bounds = array<i64: 8, 16>}, {transform_indices = @transform_1, window_bounds = array<i64: 8, 8>}, {pipeline_mode = #tpu.pipeline_mode<synchronous>, transform_indices = @transform_2, window_bounds = array<i64: 16, 128>}, {pipeline_mode = #tpu.pipeline_mode<synchronous>, transform_indices = @transform_3, window_bounds = array<i64: 8, 128>}, {pipeline_mode = #tpu.pipeline_mode<synchronous>, transform_indices = @transform_4, window_bounds = array<i64: 1, 128>}, {pipeline_mode = #tpu.pipeline_mode<synchronous>, transform_indices = @transform_5, window_bounds = array<i64: 128, 128>}, {pipeline_mode = #tpu.pipeline_mode<synchronous>, transform_indices = @transform_6, window_bounds = array<i64: 1, 128>}, {pipeline_mode = #tpu.pipeline_mode<synchronous>, transform_indices = @transform_7, window_bounds = array<i64: 1, 128>}, {transform_indices = @transform_8, window_bounds = array<i64: 1, 1>}, {transform_indices = @transform_9, window_bounds = array<i64: 1, 8>}]} {
    %c0 = arith.constant 0 : index
    %c0_0 = arith.constant 0 : index
    %0 = vector.load %arg1[%c0, %c0_0] : memref<8x16xbf16, #tpu.memory_space<vmem>>, vector<8x16xbf16>
    %c0_1 = arith.constant 0 : index
    %c0_2 = arith.constant 0 : index
    %1 = vector.load %arg3[%c0_1, %c0_2] : memref<16x128xbf16, #tpu.memory_space<vmem>>, vector<16x128xbf16>
    %cst = arith.constant dense<0.000000e+00> : vector<8x128xf32>
    %2 = tpu.matmul %0, %1, %cst {dimension_numbers = #tpu.dot_dimension_numbers<[1], [0], [0], [1], [0, 0, 1, 1], [], []>} : vector<8x16xbf16>, vector<16x128xbf16>, vector<8x128xf32> -> vector<8x128xf32>
    %c0_3 = arith.constant 0 : index
    %c0_4 = arith.constant 0 : index
    %3 = vector.load %arg2[%c0_3, %c0_4] : memref<8x8xbf16, #tpu.memory_space<vmem>>, vector<8x8xbf16>
    %c0_5 = arith.constant 0 : index
    %c0_6 = arith.constant 0 : index
    %4 = vector.load %arg4[%c0_5, %c0_6] : memref<8x128xbf16, #tpu.memory_space<vmem>>, vector<8x128xbf16>
    %cst_7 = arith.constant dense<0.000000e+00> : vector<8x128xf32>
    %5 = tpu.matmul %3, %4, %cst_7 {dimension_numbers = #tpu.dot_dimension_numbers<[1], [0], [0], [1], [0, 0, 1, 1], [], []>} : vector<8x8xbf16>, vector<8x128xbf16>, vector<8x128xf32> -> vector<8x128xf32>
    %6 = arith.addf %2, %5 : vector<8x128xf32>
    %c0_8 = arith.constant 0 : index
    %c0_9 = arith.constant 0 : index
    %7 = vector.load %arg5[%c0_8, %c0_9] : memref<1x128xf32, #tpu.memory_space<vmem>>, vector<1x128xf32>
    %8 = vector.broadcast %7 : vector<1x128xf32> to vector<8x128xf32>
    %9 = arith.addf %6, %8 : vector<8x128xf32>
    %cst_10 = arith.constant 0.000000e+00 : f32
    %10 = vector.broadcast %cst_10 : f32 to vector<8x128xf32>
    %11 = arith.maximumf %9, %10 : vector<8x128xf32>
    %12 = arith.truncf %11 : vector<8x128xf32> to vector<8x128xbf16>
    %c0_11 = arith.constant 0 : index
    %c0_12 = arith.constant 0 : index
    %13 = vector.load %arg6[%c0_11, %c0_12] : memref<128x128xbf16, #tpu.memory_space<vmem>>, vector<128x128xbf16>
    %cst_13 = arith.constant dense<0.000000e+00> : vector<8x128xf32>
    %14 = tpu.matmul %12, %13, %cst_13 {dimension_numbers = #tpu.dot_dimension_numbers<[1], [0], [0], [1], [0, 0, 1, 1], [], []>} : vector<8x128xbf16>, vector<128x128xbf16>, vector<8x128xf32> -> vector<8x128xf32>
    %c0_14 = arith.constant 0 : index
    %c0_15 = arith.constant 0 : index
    %15 = vector.load %arg7[%c0_14, %c0_15] : memref<1x128xf32, #tpu.memory_space<vmem>>, vector<1x128xf32>
    %16 = vector.broadcast %15 : vector<1x128xf32> to vector<8x128xf32>
    %17 = arith.addf %14, %16 : vector<8x128xf32>
    %cst_16 = arith.constant 0.000000e+00 : f32
    %18 = vector.broadcast %cst_16 : f32 to vector<8x128xf32>
    %19 = arith.maximumf %17, %18 : vector<8x128xf32>
    %c0_17 = arith.constant 0 : index
    %c0_18 = arith.constant 0 : index
    %20 = vector.load %arg8[%c0_17, %c0_18] : memref<1x128xf32, #tpu.memory_space<vmem>>, vector<1x128xf32>
    %21 = vector.broadcast %20 : vector<1x128xf32> to vector<8x128xf32>
    %22 = arith.mulf %19, %21 : vector<8x128xf32>
    %cst_19 = arith.constant dense<0.000000e+00> : vector<8xf32>
    %23 = vector.multi_reduction <add>, %22, %cst_19 [1] : vector<8x128xf32> to vector<8xf32>
    %24 = vector.shape_cast %23 : vector<8xf32> to vector<1x8xf32>
    %c0_20 = arith.constant 0 : index
    %c0_21 = arith.constant 0 : index
    %25 = memref.load %arg9[%c0_20, %c0_21] : memref<1x1xf32, #tpu.memory_space<smem>>
    %26 = vector.broadcast %25 : f32 to vector<1x8xf32>
    %27 = arith.addf %24, %26 : vector<1x8xf32>
    %c0_22 = arith.constant 0 : index
    %c0_23 = arith.constant 0 : index
    %28 = vector.load %arg10[%c0_22, %c0_23] : memref<1x8xf32, #tpu.memory_space<vmem>>, vector<1x8xf32>
    tpu.vector_store %arg10[%c0_22, %c0_23], %27 {strides = array<i32>} : memref<1x8xf32, #tpu.memory_space<vmem>>, vector<1x8xf32>,
    return
  }
  func.func @transform_0(%arg0: i32) -> (i32, i32) {
    %c0_i32 = arith.constant 0 : i32
    %c0_i32_0 = arith.constant 0 : i32
    return %arg0, %c0_i32 : i32, i32
  }
  func.func @transform_1(%arg0: i32) -> (i32, i32) {
    %c0_i32 = arith.constant 0 : i32
    %c0_i32_0 = arith.constant 0 : i32
    return %arg0, %c0_i32 : i32, i32
  }
  func.func @transform_2(%arg0: i32) -> (i32, i32) {
    %c0_i32 = arith.constant 0 : i32
    %c0_i32_0 = arith.constant 0 : i32
    %c0_i32_1 = arith.constant 0 : i32
    return %c0_i32, %c0_i32_0 : i32, i32
  }
  func.func @transform_3(%arg0: i32) -> (i32, i32) {
    %c0_i32 = arith.constant 0 : i32
    %c0_i32_0 = arith.constant 0 : i32
    %c0_i32_1 = arith.constant 0 : i32
    return %c0_i32, %c0_i32_0 : i32, i32
  }
  func.func @transform_4(%arg0: i32) -> (i32, i32) {
    %c0_i32 = arith.constant 0 : i32
    %c0_i32_0 = arith.constant 0 : i32
    %c0_i32_1 = arith.constant 0 : i32
    return %c0_i32, %c0_i32_0 : i32, i32
  }
  func.func @transform_5(%arg0: i32) -> (i32, i32) {
    %c0_i32 = arith.constant 0 : i32
    %c0_i32_0 = arith.constant 0 : i32
    %c0_i32_1 = arith.constant 0 : i32
    return %c0_i32, %c0_i32_0 : i32, i32
  }
  func.func @transform_6(%arg0: i32) -> (i32, i32) {
    %c0_i32 = arith.constant 0 : i32
    %c0_i32_0 = arith.constant 0 : i32
    %c0_i32_1 = arith.constant 0 : i32
    return %c0_i32, %c0_i32_0 : i32, i32
  }
  func.func @transform_7(%arg0: i32) -> (i32, i32) {
    %c0_i32 = arith.constant 0 : i32
    %c0_i32_0 = arith.constant 0 : i32
    %c0_i32_1 = arith.constant 0 : i32
    return %c0_i32, %c0_i32_0 : i32, i32
  }
  func.func @transform_8(%arg0: i32) -> (i32, i32) {
    %c0_i32 = arith.constant 0 : i32
    %c0_i32_0 = arith.constant 0 : i32
    %c0_i32_1 = arith.constant 0 : i32
    return %c0_i32, %c0_i32_0 : i32, i32
  }
  func.func @transform_9(%arg0: i32) -> (i32, i32) {
    %c0_i32 = arith.constant 0 : i32
    %c0_i32_0 = arith.constant 0 : i32
    return %c0_i32, %arg0 : i32, i32
  }
}

</mosaic_0001>

<bundles_post_ra>
// kernel: critic_forward.1
= control target key start
LH: loop header
LB: loop body
LE: loop exit
PB: predicated region body
PF: predicated region fallthrough
CT: control target
= control target key end

     0   :  { %15 = vsyncpa [#allocation4], 0  ;;  %s541_s0 = inlined_call_operand.vmem [shape: bf16[8,16], index: 0, kind: input, shape index: {}]   ;;  %s542_s1 = inlined_call_operand.vmem [shape: bf16[8,8], index: 1, kind: input, shape index: {}]   ;;  %s543_s2 = inlined_call_operand.vmem [shape: bf16[16,128], index: 2, kind: input, shape index: {}]   ;;  %s544_s3 = inlined_call_operand.vmem [shape: bf16[8,128], index: 3, kind: input, shape index: {}]   ;;  %s545_s4 = inlined_call_operand.vmem [shape: f32[1,128], index: 4, kind: input, shape index: {}]   ;;  %s546_s5 = inlined_call_operand.hbm [shape: bf16[128,128], index: 5, kind: input, shape index: {}]   ;;  %s547_s6 = inlined_call_operand.vmem [shape: f32[1,128], index: 6, kind: input, shape index: {}]   ;;  %s548_s7 = inlined_call_operand.vmem [shape: f32[1,128], index: 7, kind: input, shape index: {}]   ;;  %s549_s8 = inlined_call_operand.<no memory space> [shape: f32[1,1], index: 8, kind: input, shape index: {}]   ;;  %s550_s9 = inlined_call_operand.hbm [shape: f32[1,8], index: 9, kind: output, shape index: {}]  }
   0x1   :  { %16 = vsyncpa [#allocation5], 0  ;;  %s434_s30 = smov [#allocation3]   ;;  %s386_s13 = scalar_lea.hbm %s546_s5, 1024 }
   0x2   :  { %s32_s10 = sshll.u32 %s434_s30, 4  ;;  %p387_p0 = scmp.ne.s32.totalorder %s546_s5, %s386_s13  ;;  %s33_s10 = int_to_ptr.vmem [resolvable:$true] %s32_s10 }
   0x3   :  { %p390_p1 = scmp.lt.u32.totalorder %s386_s13, %s546_s5 }
   0x5   :  { %p392_p2 = pnand %p390_p1, %p387_p0 }
   0x7   :  { %395 = shalt.err (!%p392_p2)
}
   0x8   :  { %s396_s18 = scalar_lea.vmem %s33_s10, 1024  ;;  %p401_p4 = scmp.lt.s32.totalorder %s33_s10, %s33_s10 }
   0x9   :  { %p397_p3 = scmp.ne.s32.totalorder %s33_s10, %s396_s18  ;;  %p402_p5 = scmp.lt.s32.totalorder %s396_s18, %s396_s18 }
   0xb   :  { %p403_p6 = por %p402_p5, %p401_p4 }
   0xd   :  { %p404_p7 = pnand %p403_p6, %p397_p3 }
   0xf   :  { %407 = shalt.err (!%p404_p7)
}
  0x10   :  { %s435_s19 = smov 64   ;;  %s436_s20 = smov 4  }
  0x11   :  { %38 = dma.hbm_to_vmem [thread:$0]  %s546_s5, 1024, %s33_s10, [#allocation4], %s435_s19, %s435_s19, %s436_s20  }
  0x12   :  { %430 = dma.done.wait [#allocation4], 1024  }
  0x13   :  { %431 = vsyncadd [#allocation4], 4294966272  ;;  %v437_v0 = vmov 0.0   ;;  %vm438_vm0 = vmmov 0   ;;  %vm58_vm1 = vcmask 1043456   ;;  %v377_v4 = vld [vmem:[%s543_s2] sm:$0xff]   ;;  %v288_v36 = vlaneseq }
  0x14   :  { %339 = vmatprep.subr.bf16.mxu1 %v437_v0  ;;  %341 = vmatprep.mubr.msk.bf16.mxu1 %vm438_vm0, %v437_v0  ;;  %v53_v1 = vld [vmem:[%s544_s3] sm:$0xf]  ;;  %vm54_vm2 = vcmask 64512   ;;  %v379_v6 = vld [vmem:[#allocation3 + $0x8] sm:$0xff]   ;;  %v380_v7 = vld [vmem:[#allocation3 + $0x10] sm:$0xff]   ;;  %vm108_vm3 = vcmask 130048   ;;  %v285_v39 = vstv %s549_s8 }
  0x15   :  { %351 = vmatprep.subr.bf16.mxu0 %v437_v0  ;;  %367 = vmatprep.mubr.msk.bf16.mxu0 %vm438_vm0, %v437_v0  ;;  %v60_v2 = vsel %vm58_vm1, %v53_v1, 0  ;;  %v52_v3 = vld [vmem:[%s542_s1] sm:$0xf]  ;;  %v381_v9 = vld [vmem:[#allocation3 + $0x18] sm:$0xff]   ;;  %v383_v11 = vld [vmem:[#allocation3 + $0x28] sm:$0xff]   ;;  %v289_v37 = vand.u32 127, %v288_v36 }
  0x16   :  { %340 = vmatpush3.bf16.msra.mxu1 %v60_v2  ;;  %v378_v5 = vld [vmem:[#allocation3] sm:$0xff]   ;;  %v384_v12 = vld [vmem:[#allocation3 + $0x30] sm:$0xff]   ;;  %v385_v13 = vld [vmem:[#allocation3 + $0x38] sm:$0xff]   ;;  %v291_v38 = vshrl.u32 %v288_v36, 7  ;;  %vm295_vm4 = vcmask 57344  }
  0x17   :  { %345 = vmatprep.subr.bf16.mxu1 %v437_v0  ;;  %352 = vmatpush3.bf16.msra.mxu0 %v378_v5  ;;  %v49_v8 = vld [vmem:[%s541_s0] sm:$0xf] }
  0x18   :  { %353 = vmatprep.subr.bf16.mxu0 %v437_v0  ;;  %v382_v10 = vld [vmem:[#allocation3 + $0x20] sm:$0xff]   ;;  %v292_v40 = vsub.s32 %v289_v37, %v291_v38 }
  0x19   :  { %342 = vmatmul.mubr.msk.bf16.vlgmr.msra.gmra.mrb[0].mxu1 %vm54_vm2, %v52_v3  ;;  %v315_v19 = vld [vmem:[%s545_s4] ss:$0 sm:$0xff] }
  0x1a   :  { %346 = vmatpush3.bf16.msra.mxu1 %v377_v4  ;;  %347 = vmatprep.mubr.msk.bf16.mxu1 %vm438_vm0, %v437_v0  ;;  %v316_v27 = vld [vmem:[%s547_s6] ss:$0 sm:$0xff]  ;;  %s439_s6 = smov [#allocation6]  }
  0x1b   :  { %354 = vmatpush3.bf16.msra.mxu0 %v379_v6  ;;  %v325_v32 = vld [vmem:[%s548_s7] ss:$0 sm:$0xff]  ;;  %s303_s12 = sshll.u32 %s439_s6, 4  ;;  %s304_s12 = int_to_ptr.vmem [resolvable:$true] %s303_s12 }
  0x1c   :  { %355 = vmatprep.subr.bf16.mxu0 %v437_v0  ;;  %s408_s7 = scalar_lea.vmem %s304_s12, 16  ;;  %s412_s13 = scalar_lea.vmem %s304_s12, 32 }
  0x1d   :  { %p409_p8 = scmp.ne.s32.totalorder %s304_s12, %s408_s7  ;;  %p413_p9 = scmp.lt.s32.totalorder %s304_s12, %s304_s12 }
  0x1e   :  { %p414_p10 = scmp.lt.s32.totalorder %s412_s13, %s408_s7 }
  0x1f   :  { %356 = vmatpush3.bf16.msra.mxu0 %v380_v7 }
  0x20   :  { %357 = vmatprep.subr.bf16.mxu0 %v437_v0  ;;  %p415_p11 = por %p414_p10, %p413_p9 }
  0x21   :  { %348 = vmatmul.mubr.msk.bf16.vlgmr.msra.gmra.mrb[4].mxu1 %vm108_vm3, %v49_v8 }
  0x22   :  { %p416_p12 = pnand %p415_p11, %p409_p8 }
  0x23   :  { %358 = vmatpush3.bf16.msra.mxu0 %v381_v9 }
  0x24   :  { %359 = vmatprep.subr.bf16.mxu0 %v437_v0 }
  0x27   :  { %360 = vmatpush3.bf16.msra.mxu0 %v382_v10 }
  0x28   :  { %361 = vmatprep.subr.bf16.mxu0 %v437_v0 }
  0x2b   :  { %362 = vmatpush3.bf16.msra.mxu0 %v383_v11 }
  0x2c   :  { %363 = vmatprep.subr.bf16.mxu0 %v437_v0 }
  0x2f   :  { %364 = vmatpush3.bf16.msra.mxu0 %v384_v12 }
  0x30   :  { %365 = vmatprep.subr.bf16.mxu0 %v437_v0 }
  0x33   :  { %366 = vmatpush3.bf16.msra.mxu0 %v385_v13 }
  0xec   :  { %v96_v14 = vpop.f32.mrb[0].mxu1 }
  0xed   :  { %v343_v15 = vpop.f32.mrb[1].mxu1 }
  0xee   :  { %v99_v16 = vpop.f32.mrb[2].mxu1 }
  0xef   :  { %v344_v17 = vpop.f32.mrb[3].mxu1 }
  0xf4   :  { %v146_v18 = vpop.f32.mrb[4].mxu1 }
  0xf5   :  { %v147_v20 = vadd.f32 %v146_v18, %v96_v14  ;;  %v349_v21 = vpop.f32.mrb[5].mxu1 }
  0xf6   :  { %v149_v22 = vpop.f32.mrb[6].mxu1 }
  0xf7   :  { %v159_v23 = vadd.f32 %v315_v19, %v147_v20  ;;  %v350_v24 = vpop.f32.mrb[7].mxu1 }
  0xf9   :  { %v160_v25 = vmax.f32 %v159_v23, 0.0 }
  0xfb   :  { %v161_v26 = vpack.c.bf16 %v160_v25, %v160_v25 }
  0xfd   :  { %368 = vmatmul.mubr.bf16.vlgmr.msra.gmra.mrb[0].mxu0 %v161_v26 }
 0x1d0   :  { %v267_v28 = vpop.f32.mrb[0].mxu0 }
 0x1d1   :  { %v268_v29 = vadd.f32 %v316_v27, %v267_v28  ;;  %v369_v30 = vpop.f32.mrb[1].mxu0 }
 0x1d2   :  { %v270_v31 = vpop.f32.mrb[2].mxu0 }
 0x1d3   :  { %v273_v33 = vmax.f32 %v268_v29, 0.0  ;;  %v370_v34 = vpop.f32.mrb[3].mxu0 }
 0x1d5   :  { %v281_v35 = vmul.f32 %v325_v32, %v273_v33 }
 0x1d7   :  { %282 = vadd.xlane.f32.xlu0 %v281_v35 }
 0x264   :  { %v283_v41 = vpop.xlane.xlu0 %282 }
 0x265   :  { %v286_v42 = vadd.f32 %v285_v39, %v283_v41 }
 0x267   :  { %v293_v43 = vrot.slane %v286_v42, %v292_v40 }
 0x269   :  { %296 = vst.msk [vmem:[#allocation6] sm:$0x1] %vm295_vm4, %v293_v43 }
 0x26a   :  { %419 = shalt.err (!%p416_p12)
}
 0x26b   :  { %s420_s8 = scalar_lea.hbm %s550_s9, 16 }
 0x26c   :  { %p421_p13 = scmp.ne.s32.totalorder %s550_s9, %s420_s8  ;;  %p424_p0 = scmp.lt.u32.totalorder %s420_s8, %s550_s9 }
 0x26e   :  { %p426_p1 = pnand %p424_p0, %p421_p13 }
 0x270   :  { %429 = shalt.err (!%p426_p1)
}
 0x271   :  { %306 = dma.vmem_to_hbm [thread:$0]  %s304_s12, 16, %s550_s9, [#allocation5]  }
 0x272   :  { %432 = dma.done.wait [#allocation5], 16  }
 0x273   :  { %433 = vsyncadd [#allocation5], 4294967280 }
 0x274   :  { %310 = vsyncpa [#allocation4], 1 }
 0x275   :  { %311 = vsyncpa [#allocation5], 1 }

</bundles_post_ra>
